<compile_context>
chip_gen: v7x
topology: tpu7x:2x2x1
jax: 0.10.0
libtpu: 0.0.40
codegen_flags: <defaults>
</compile_context>

<pallas_src>
import functools

import jax
import jax.numpy as jnp
import numpy as np
from jax.experimental import pallas as pl
from jax.experimental.pallas import tpu as pltpu


# ----------------------------------------------------------------------------
# Fused kernel: conv1 (1x1) -> softmax(0.5*fc, over K) -> W1^T @ seg -> ReLU
#               -> conv2 (1x1, no bias) -> BatchNorm (train-mode batch stats)
#               -> 0.5*(bn + x) -> ReLU.
# All 2-D tiles are (channels, lanes): channels on sublanes, B*N on lanes.
# ----------------------------------------------------------------------------
def _refine_block_kernel(x_ref, w1_ref, w2_ref, small_ref, fc_ref, out_ref, *, eps):
    B, C, N = x_ref.shape
    K = w1_ref.shape[0]
    count = float(B * N)

    w1 = w1_ref[...]                 # (K, C)
    w2 = w2_ref[...]                 # (C, C)
    b1 = small_ref[0][:K]            # (K, 1)   packed small params (one DMA)
    gamma = small_ref[1][:C]         # (C, 1)
    beta = small_ref[2][:C]          # (C, 1)

    # Fold batch into the lane axis: lane-concat of (C, N) tiles -> (C, B*N).
    x_all = jnp.concatenate([x_ref[b] for b in range(B)], axis=1)

    # conv1 (1x1): fc = W1 @ x + b1                                   (K, B*N)
    fc_all = jnp.dot(w1, x_all, preferred_element_type=jnp.float32) + b1
    for b in range(B):               # lane-dense, 128-aligned slices -> vst
        fc_ref[b] = fc_all[:, b * N:(b + 1) * N]

    # softmax over K (sublane axis) of 0.5*fc; exact divide done once on the
    # reduced (1, B*N) row (approx reciprocal risks the 1e-4 tolerance).
    s = fc_all * 0.5
    s = s - jnp.max(s, axis=0, keepdims=True)
    p = jnp.exp(s)
    inv = 1.0 / jnp.sum(p, axis=0, keepdims=True)
    seg = p * inv                                                     # (K, B*N)

    # refine_feat = W1^T @ seg (contract K directly, no materialized transpose)
    ref_all = jax.lax.dot_general(
        w1, seg, dimension_numbers=(((0,), (0,)), ((), ())),
        preferred_element_type=jnp.float32)                           # (C, B*N)
    ref_all = jnp.maximum(ref_all, 0.0)

    # conv2 (1x1, bias=False)
    y_all = jnp.dot(w2, ref_all, preferred_element_type=jnp.float32)  # (C, B*N)

    # Train-mode BatchNorm over (B, N): batch lives on lanes, so mean/var are
    # single axis=1 reductions. Two-pass (numerically stable) biased variance.
    mean = jnp.sum(y_all, axis=1, keepdims=True) * (1.0 / count)      # (C, 1)
    d = y_all - mean
    var = jnp.sum(d * d, axis=1, keepdims=True) * (1.0 / count)       # (C, 1)
    inv_std = jax.lax.rsqrt(var + eps)
    scale = gamma * inv_std
    shift = beta - gamma * mean * inv_std

    # BN affine + residual + ReLU, then lane-dense per-batch stores.
    out_all = jnp.maximum(0.5 * (y_all * scale + shift + x_all), 0.0)
    for b in range(B):
        out_ref[b] = out_all[:, b * N:(b + 1) * N]


# ----------------------------------------------------------------------------
# Wrapper: only free NCHW <-> (B, C, H*W) reshapes + tiny param packing,
# one pallas_call.
# ----------------------------------------------------------------------------
def refine_block_forward(x_nchw, params, eps=1e-5):
    w1, b1, w2 = params["w1"], params["b1"], params["w2"]
    gamma, beta = params["gamma"], params["beta"]

    B, C, H, W = x_nchw.shape
    K = w1.shape[0]
    N = H * W
    Cp = max(K, C)

    x = x_nchw.reshape(B, C, N)          # contiguous reshape, no transpose

    # Pack b1/gamma/beta into one (3, Cp, 1) operand -> single DMA descriptor.
    def _pad(v):
        return jnp.pad(v.astype(jnp.float32), (0, Cp - v.shape[0]))
    small = jnp.stack([_pad(b1), _pad(gamma), _pad(beta)], axis=0).reshape(3, Cp, 1)

    kernel = functools.partial(_refine_block_kernel, eps=eps)

    fc, out = pl.pallas_call(
        kernel,
        out_shape=(jax.ShapeDtypeStruct((B, K, N), jnp.float32),
                   jax.ShapeDtypeStruct((B, C, N), jnp.float32)),
        grid_spec=pltpu.PrefetchScalarGridSpec(
            num_scalar_prefetch=0,
            grid=(1,),                    # single step: whole problem in VMEM
            in_specs=[pl.BlockSpec((B, C, N), lambda i: (0, 0, 0)),
                      pl.BlockSpec((K, C), lambda i: (0, 0)),
                      pl.BlockSpec((C, C), lambda i: (0, 0)),
                      pl.BlockSpec((3, Cp, 1), lambda i: (0, 0, 0))],
            out_specs=[pl.BlockSpec((B, K, N), lambda i: (0, 0, 0)),
                       pl.BlockSpec((B, C, N), lambda i: (0, 0, 0))]),
        compiler_params=pltpu.CompilerParams(
            dimension_semantics=("arbitrary",)),
    )(x, w1, w2, small)

    refined = out.reshape(B, C, H, W)     # free reshapes back to NCHW
    fc_out = fc.reshape(B, K, H, W)
    return refined, fc_out


# ----------------------------------------------------------------------------
# Pure-JAX reference (mirrors the PyTorch forward in NCHW) for validation.
# ----------------------------------------------------------------------------
def refine_block_ref(x, params, eps=1e-5):
    w1, b1, w2 = params["w1"], params["b1"], params["w2"]
    gamma, beta = params["gamma"], params["beta"]
    fc = jnp.einsum("kc,bchw->bkhw", w1, x) + b1[None, :, None, None]
    seg = jax.nn.softmax(fc * 0.5, axis=1)
    ref = jnp.maximum(jnp.einsum("kc,bkhw->bchw", w1, seg), 0.0)
    y = jnp.einsum("dc,bchw->bdhw", w2, ref)
    mean = jnp.mean(y, axis=(0, 2, 3))
    var = jnp.mean((y - mean[None, :, None, None]) ** 2, axis=(0, 2, 3))
    bn = (gamma[None, :, None, None] * (y - mean[None, :, None, None])
          / jnp.sqrt(var + eps)[None, :, None, None]) + beta[None, :, None, None]
    out = jnp.maximum(0.5 * (bn + x), 0.0)
    return out, fc


if __name__ == "__main__":
    # module config: refine_block(c=16, k=8); input x: (B=2, C=16, H=16, W=16)
    B, C, K, H, W = 2, 16, 8, 16, 16

    key = jax.random.PRNGKey(0)
    kx, kw1, kb1, kw2 = jax.random.split(key, 4)

    x = jax.random.normal(kx, (B, C, H, W), dtype=jnp.float32)
    params = {
        # conv1: Conv2d(c, k, 1) -> weight (K, C, 1, 1) squeezed to (K, C), bias (K,)
        "w1": 0.2 * jax.random.normal(kw1, (K, C), dtype=jnp.float32),
        "b1": 0.1 * jax.random.normal(kb1, (K,), dtype=jnp.float32),
        # conv2: Conv2d(c, c, 1, bias=False) -> weight (C, C)
        "w2": 0.2 * jax.random.normal(kw2, (C, C), dtype=jnp.float32),
        # SynchronizedBatchNorm2d(c) default affine init
        "gamma": jnp.ones((C,), dtype=jnp.float32),
        "beta": jnp.zeros((C,), dtype=jnp.float32),
    }

    refined, fc_out = refine_block_forward(x, params)
    jax.block_until_ready((refined, fc_out))

    refined_ref, fc_ref = refine_block_ref(x, params)
    np.testing.assert_allclose(np.asarray(fc_out), np.asarray(fc_ref),
                               rtol=1e-4, atol=1e-4)
    np.testing.assert_allclose(np.asarray(refined), np.asarray(refined_ref),
                               rtol=1e-4, atol=1e-4)

    print("KERNEL_OK")
</pallas_src>

<mosaic_0001>
module attributes {stable_mosaic.version = 11 : i64} {
  func.func @_refine_block_kernel(%arg0: i32, %arg1: memref<2x16x256xf32, #tpu.memory_space<vmem>>, %arg2: memref<8x16xf32, #tpu.memory_space<vmem>>, %arg3: memref<16x16xf32, #tpu.memory_space<vmem>>, %arg4: memref<3x16x1xf32, #tpu.memory_space<vmem>>, %arg5: memref<2x8x256xf32, #tpu.memory_space<vmem>>, %arg6: memref<2x16x256xf32, #tpu.memory_space<vmem>>) attributes {dimension_semantics = [#tpu.dimension_semantics<arbitrary>], iteration_bounds = array<i64: 1>, scalar_prefetch = 0 : i64, scratch_operands = 0 : i64, tpu.core_type = #tpu.core_type<tc>, window_params = [{pipeline_mode = #tpu.pipeline_mode<synchronous>, transform_indices = @transform_0, window_bounds = array<i64: 2, 16, 256>}, {pipeline_mode = #tpu.pipeline_mode<synchronous>, transform_indices = @transform_1, window_bounds = array<i64: 8, 16>}, {pipeline_mode = #tpu.pipeline_mode<synchronous>, transform_indices = @transform_2, window_bounds = array<i64: 16, 16>}, {pipeline_mode = #tpu.pipeline_mode<synchronous>, transform_indices = @transform_3, window_bounds = array<i64: 3, 16, 1>}, {pipeline_mode = #tpu.pipeline_mode<synchronous>, transform_indices = @transform_4, window_bounds = array<i64: 2, 8, 256>}, {pipeline_mode = #tpu.pipeline_mode<synchronous>, transform_indices = @transform_5, window_bounds = array<i64: 2, 16, 256>}]} {
    %c0 = arith.constant 0 : index
    %c0_0 = arith.constant 0 : index
    %0 = vector.load %arg2[%c0, %c0_0] : memref<8x16xf32, #tpu.memory_space<vmem>>, vector<8x16xf32>
    %c0_1 = arith.constant 0 : index
    %c0_2 = arith.constant 0 : index
    %1 = vector.load %arg3[%c0_1, %c0_2] : memref<16x16xf32, #tpu.memory_space<vmem>>, vector<16x16xf32>
    %c0_3 = arith.constant 0 : index
    %c0_4 = arith.constant 0 : index
    %c0_5 = arith.constant 0 : index
    %2 = vector.load %arg4[%c0_3, %c0_4, %c0_5] : memref<3x16x1xf32, #tpu.memory_space<vmem>>, vector<1x16x1xf32>
    %3 = vector.shape_cast %2 : vector<1x16x1xf32> to vector<16x1xf32>
    %4 = vector.extract_strided_slice %3 {offsets = [0, 0], sizes = [8, 1], strides = [1, 1]} : vector<16x1xf32> to vector<8x1xf32>
    %c1 = arith.constant 1 : index
    %c0_6 = arith.constant 0 : index
    %c0_7 = arith.constant 0 : index
    %5 = vector.load %arg4[%c1, %c0_6, %c0_7] : memref<3x16x1xf32, #tpu.memory_space<vmem>>, vector<1x16x1xf32>
    %6 = vector.shape_cast %5 : vector<1x16x1xf32> to vector<16x1xf32>
    %c2 = arith.constant 2 : index
    %c0_8 = arith.constant 0 : index
    %c0_9 = arith.constant 0 : index
    %7 = vector.load %arg4[%c2, %c0_8, %c0_9] : memref<3x16x1xf32, #tpu.memory_space<vmem>>, vector<1x16x1xf32>
    %8 = vector.shape_cast %7 : vector<1x16x1xf32> to vector<16x1xf32>
    %c0_10 = arith.constant 0 : index
    %c0_11 = arith.constant 0 : index
    %c0_12 = arith.constant 0 : index
    %9 = vector.load %arg1[%c0_10, %c0_11, %c0_12] : memref<2x16x256xf32, #tpu.memory_space<vmem>>, vector<1x16x256xf32>
    %10 = vector.shape_cast %9 : vector<1x16x256xf32> to vector<16x256xf32>
    %c1_13 = arith.constant 1 : index
    %c0_14 = arith.constant 0 : index
    %c0_15 = arith.constant 0 : index
    %11 = vector.load %arg1[%c1_13, %c0_14, %c0_15] : memref<2x16x256xf32, #tpu.memory_space<vmem>>, vector<1x16x256xf32>
    %12 = vector.shape_cast %11 : vector<1x16x256xf32> to vector<16x256xf32>
    %13 = tpu.concatenate %10, %12 in 1 : vector<16x256xf32>, vector<16x256xf32> -> vector<16x512xf32>
    %cst = arith.constant dense<0.000000e+00> : vector<8x512xf32>
    %14 = tpu.matmul %0, %13, %cst {dimension_numbers = #tpu.dot_dimension_numbers<[1], [0], [0], [1], [0, 0, 1, 1], [], []>} : vector<8x16xf32>, vector<16x512xf32>, vector<8x512xf32> -> vector<8x512xf32>
    %15 = vector.broadcast %4 : vector<8x1xf32> to vector<8x512xf32>
    %16 = arith.addf %14, %15 : vector<8x512xf32>
    %17 = vector.extract_strided_slice %16 {offsets = [0, 0], sizes = [8, 256], strides = [1, 1]} : vector<8x512xf32> to vector<8x256xf32>
    %c0_16 = arith.constant 0 : index
    %c0_17 = arith.constant 0 : index
    %c0_18 = arith.constant 0 : index
    %18 = vector.load %arg5[%c0_16, %c0_17, %c0_18] : memref<2x8x256xf32, #tpu.memory_space<vmem>>, vector<1x8x256xf32>
    %19 = vector.shape_cast %18 : vector<1x8x256xf32> to vector<8x256xf32>
    %20 = vector.shape_cast %17 : vector<8x256xf32> to vector<1x8x256xf32>
    tpu.vector_store %arg5[%c0_16, %c0_17, %c0_18], %20 {strides = array<i32>} : memref<2x8x256xf32, #tpu.memory_space<vmem>>, vector<1x8x256xf32>,
    %21 = vector.extract_strided_slice %16 {offsets = [0, 256], sizes = [8, 256], strides = [1, 1]} : vector<8x512xf32> to vector<8x256xf32>
    %c1_19 = arith.constant 1 : index
    %c0_20 = arith.constant 0 : index
    %c0_21 = arith.constant 0 : index
    %22 = vector.load %arg5[%c1_19, %c0_20, %c0_21] : memref<2x8x256xf32, #tpu.memory_space<vmem>>, vector<1x8x256xf32>
    %23 = vector.shape_cast %22 : vector<1x8x256xf32> to vector<8x256xf32>
    %24 = vector.shape_cast %21 : vector<8x256xf32> to vector<1x8x256xf32>
    tpu.vector_store %arg5[%c1_19, %c0_20, %c0_21], %24 {strides = array<i32>} : memref<2x8x256xf32, #tpu.memory_space<vmem>>, vector<1x8x256xf32>,
    %cst_22 = arith.constant 5.000000e-01 : f32
    %25 = vector.broadcast %cst_22 : f32 to vector<8x512xf32>
    %26 = arith.mulf %16, %25 : vector<8x512xf32>
    %cst_23 = arith.constant dense<0xFF800000> : vector<512xf32>
    %27 = vector.multi_reduction <maximumf>, %26, %cst_23 [0] : vector<8x512xf32> to vector<512xf32>
    %28 = vector.shape_cast %27 : vector<512xf32> to vector<1x512xf32>
    %29 = vector.broadcast %28 : vector<1x512xf32> to vector<8x512xf32>
    %30 = arith.subf %26, %29 : vector<8x512xf32>
    %31 = math.exp %30 : vector<8x512xf32>
    %cst_24 = arith.constant dense<0.000000e+00> : vector<512xf32>
    %32 = vector.multi_reduction <add>, %31, %cst_24 [0] : vector<8x512xf32> to vector<512xf32>
    %33 = vector.shape_cast %32 : vector<512xf32> to vector<1x512xf32>
    %cst_25 = arith.constant 1.000000e+00 : f32
    %34 = vector.broadcast %cst_25 : f32 to vector<1x512xf32>
    %35 = arith.divf %34, %33 : vector<1x512xf32>
    %36 = vector.broadcast %35 : vector<1x512xf32> to vector<8x512xf32>
    %37 = arith.mulf %31, %36 : vector<8x512xf32>
    %cst_26 = arith.constant dense<0.000000e+00> : vector<16x512xf32>
    %38 = tpu.matmul %0, %37, %cst_26 {dimension_numbers = #tpu.dot_dimension_numbers<[0], [0], [1], [1], [0, 1, 1, 1], [], []>} : vector<8x16xf32>, vector<8x512xf32>, vector<16x512xf32> -> vector<16x512xf32>
    %cst_27 = arith.constant 0.000000e+00 : f32
    %39 = vector.broadcast %cst_27 : f32 to vector<16x512xf32>
    %40 = arith.maximumf %38, %39 : vector<16x512xf32>
    %cst_28 = arith.constant dense<0.000000e+00> : vector<16x512xf32>
    %41 = tpu.matmul %1, %40, %cst_28 {dimension_numbers = #tpu.dot_dimension_numbers<[1], [0], [0], [1], [0, 0, 1, 1], [], []>} : vector<16x16xf32>, vector<16x512xf32>, vector<16x512xf32> -> vector<16x512xf32>
    %cst_29 = arith.constant dense<0.000000e+00> : vector<16xf32>
    %42 = vector.multi_reduction <add>, %41, %cst_29 [1] : vector<16x512xf32> to vector<16xf32>
    %43 = vector.shape_cast %42 : vector<16xf32> to vector<16x1xf32>
    %cst_30 = arith.constant 0.001953125 : f32
    %44 = vector.broadcast %cst_30 : f32 to vector<16x1xf32>
    %45 = arith.mulf %43, %44 : vector<16x1xf32>
    %46 = vector.broadcast %45 : vector<16x1xf32> to vector<16x512xf32>
    %47 = arith.subf %41, %46 : vector<16x512xf32>
    %48 = arith.mulf %47, %47 : vector<16x512xf32>
    %cst_31 = arith.constant dense<0.000000e+00> : vector<16xf32>
    %49 = vector.multi_reduction <add>, %48, %cst_31 [1] : vector<16x512xf32> to vector<16xf32>
    %50 = vector.shape_cast %49 : vector<16xf32> to vector<16x1xf32>
    %cst_32 = arith.constant 0.001953125 : f32
    %51 = vector.broadcast %cst_32 : f32 to vector<16x1xf32>
    %52 = arith.mulf %50, %51 : vector<16x1xf32>
    %cst_33 = arith.constant 9.99999974E-6 : f32
    %53 = vector.broadcast %cst_33 : f32 to vector<16x1xf32>
    %54 = arith.addf %52, %53 : vector<16x1xf32>
    %55 = math.rsqrt %54 : vector<16x1xf32>
    %56 = arith.mulf %6, %55 : vector<16x1xf32>
    %57 = arith.mulf %6, %45 : vector<16x1xf32>
    %58 = arith.mulf %57, %55 : vector<16x1xf32>
    %59 = arith.subf %8, %58 : vector<16x1xf32>
    %60 = vector.broadcast %56 : vector<16x1xf32> to vector<16x512xf32>
    %61 = arith.mulf %41, %60 : vector<16x512xf32>
    %62 = vector.broadcast %59 : vector<16x1xf32> to vector<16x512xf32>
    %63 = arith.addf %61, %62 : vector<16x512xf32>
    %64 = arith.addf %63, %13 : vector<16x512xf32>
    %cst_34 = arith.constant 5.000000e-01 : f32
    %65 = vector.broadcast %cst_34 : f32 to vector<16x512xf32>
    %66 = arith.mulf %65, %64 : vector<16x512xf32>
    %cst_35 = arith.constant 0.000000e+00 : f32
    %67 = vector.broadcast %cst_35 : f32 to vector<16x512xf32>
    %68 = arith.maximumf %66, %67 : vector<16x512xf32>
    %69 = vector.extract_strided_slice %68 {offsets = [0, 0], sizes = [16, 256], strides = [1, 1]} : vector<16x512xf32> to vector<16x256xf32>
    %c0_36 = arith.constant 0 : index
    %c0_37 = arith.constant 0 : index
    %c0_38 = arith.constant 0 : index
    %70 = vector.load %arg6[%c0_36, %c0_37, %c0_38] : memref<2x16x256xf32, #tpu.memory_space<vmem>>, vector<1x16x256xf32>
    %71 = vector.shape_cast %70 : vector<1x16x256xf32> to vector<16x256xf32>
    %72 = vector.shape_cast %69 : vector<16x256xf32> to vector<1x16x256xf32>
    tpu.vector_store %arg6[%c0_36, %c0_37, %c0_38], %72 {strides = array<i32>} : memref<2x16x256xf32, #tpu.memory_space<vmem>>, vector<1x16x256xf32>,
    %73 = vector.extract_strided_slice %68 {offsets = [0, 256], sizes = [16, 256], strides = [1, 1]} : vector<16x512xf32> to vector<16x256xf32>
    %c1_39 = arith.constant 1 : index
    %c0_40 = arith.constant 0 : index
    %c0_41 = arith.constant 0 : index
    %74 = vector.load %arg6[%c1_39, %c0_40, %c0_41] : memref<2x16x256xf32, #tpu.memory_space<vmem>>, vector<1x16x256xf32>
    %75 = vector.shape_cast %74 : vector<1x16x256xf32> to vector<16x256xf32>
    %76 = vector.shape_cast %73 : vector<16x256xf32> to vector<1x16x256xf32>
    tpu.vector_store %arg6[%c1_39, %c0_40, %c0_41], %76 {strides = array<i32>} : memref<2x16x256xf32, #tpu.memory_space<vmem>>, vector<1x16x256xf32>,
    return
  }
  func.func @transform_0(%arg0: i32) -> (i32, i32, i32) {
    %c0_i32 = arith.constant 0 : i32
    %c0_i32_0 = arith.constant 0 : i32
    %c0_i32_1 = arith.constant 0 : i32
    %c0_i32_2 = arith.constant 0 : i32
    return %c0_i32, %c0_i32_0, %c0_i32_1 : i32, i32, i32
  }
  func.func @transform_1(%arg0: i32) -> (i32, i32) {
    %c0_i32 = arith.constant 0 : i32
    %c0_i32_0 = arith.constant 0 : i32
    %c0_i32_1 = arith.constant 0 : i32
    return %c0_i32, %c0_i32_0 : i32, i32
  }
  func.func @transform_2(%arg0: i32) -> (i32, i32) {
    %c0_i32 = arith.constant 0 : i32
    %c0_i32_0 = arith.constant 0 : i32
    %c0_i32_1 = arith.constant 0 : i32
    return %c0_i32, %c0_i32_0 : i32, i32
  }
  func.func @transform_3(%arg0: i32) -> (i32, i32, i32) {
    %c0_i32 = arith.constant 0 : i32
    %c0_i32_0 = arith.constant 0 : i32
    %c0_i32_1 = arith.constant 0 : i32
    %c0_i32_2 = arith.constant 0 : i32
    return %c0_i32, %c0_i32_0, %c0_i32_1 : i32, i32, i32
  }
  func.func @transform_4(%arg0: i32) -> (i32, i32, i32) {
    %c0_i32 = arith.constant 0 : i32
    %c0_i32_0 = arith.constant 0 : i32
    %c0_i32_1 = arith.constant 0 : i32
    %c0_i32_2 = arith.constant 0 : i32
    return %c0_i32, %c0_i32_0, %c0_i32_1 : i32, i32, i32
  }
  func.func @transform_5(%arg0: i32) -> (i32, i32, i32) {
    %c0_i32 = arith.constant 0 : i32
    %c0_i32_0 = arith.constant 0 : i32
    %c0_i32_1 = arith.constant 0 : i32
    %c0_i32_2 = arith.constant 0 : i32
    return %c0_i32, %c0_i32_0, %c0_i32_1 : i32, i32, i32
  }
}

</mosaic_0001>

<bundles_post_ra>
// kernel: tpu_custom_call.1
= control target key start
LH: loop header
LB: loop body
LE: loop exit
PB: predicated region body
PF: predicated region fallthrough
CT: control target
= control target key end

     0   :  { %11 = vsyncpa [#allocation3], 0  ;;  %s1126_s0 = inlined_call_operand.hbm [shape: f32[2,16,256], index: 0, kind: input, shape index: {}]   ;;  %s1127_s1 = inlined_call_operand.vmem [shape: f32[8,16], index: 1, kind: input, shape index: {}]   ;;  %s1128_s2 = inlined_call_operand.vmem [shape: f32[16,16], index: 2, kind: input, shape index: {}]   ;;  %s1129_s3 = inlined_call_operand.vmem [shape: f32[3,16,1], index: 3, kind: input, shape index: {}]   ;;  %s1130_s4 = inlined_call_operand.hbm [shape: f32[2,8,256], index: 4, kind: output, shape index: {0}]   ;;  %s1131_s5 = inlined_call_operand.hbm [shape: f32[2,16,256], index: 5, kind: output, shape index: {1}]  }
   0x1   :  { %12 = vsyncpa [#allocation4], 0 }
   0x2   :  { %13 = vsyncpa [#allocation7], 0  ;;  %s932_s18 = smov [#allocation2]   ;;  %s860_s22 = scalar_lea.hbm %s1126_s0, 1024 }
   0x3   :  { %s19_s19 = sshll.u32 %s932_s18, 4  ;;  %p861_p0 = scmp.ne.s32.totalorder %s1126_s0, %s860_s22  ;;  %s20_s19 = int_to_ptr.vmem [resolvable:$true] %s19_s19 }
   0x4   :  { %p864_p1 = scmp.lt.u32.totalorder %s860_s22, %s1126_s0 }
   0x6   :  { %p866_p2 = pnand %p864_p1, %p861_p0 }
   0x8   :  { %869 = shalt.err (!%p866_p2)
}
   0x9   :  { %s870_s27 = scalar_lea.vmem %s20_s19, 1024  ;;  %p875_p4 = scmp.lt.s32.totalorder %s20_s19, %s20_s19 }
   0xa   :  { %p871_p3 = scmp.ne.s32.totalorder %s20_s19, %s870_s27  ;;  %p876_p5 = scmp.lt.s32.totalorder %s870_s27, %s870_s27 }
   0xc   :  { %p877_p6 = por %p876_p5, %p875_p4 }
   0xe   :  { %p878_p7 = pnand %p877_p6, %p871_p3 }
  0x10   :  { %881 = shalt.err (!%p878_p7)
}
  0x11   :  { %s933_s28 = smov 256   ;;  %s934_s29 = smov 16  }
  0x12   :  { %25 = dma.hbm_to_vmem [thread:$0]  %s1126_s0, 1024, %s20_s19, [#allocation3], %s933_s28, %s933_s28, %s934_s29  }
  0x13   :  { %926 = dma.done.wait [#allocation3], 1024  }
  0x14   :  { %927 = vsyncadd [#allocation3], 4294966272  ;;  %v935_v0 = vmov 0.0   ;;  %v936_v1 = vmov 0   ;;  %v986_v2 = vld [vmem:[#allocation2 + $0x8] sm:$0xff]  ;;  %v988_v3 = vld [vmem:[#allocation2 + $0x18] sm:$0xff] }
  0x15   :  { %127 = vmatprep.mubr.f32.mxu0 %v935_v0  ;;  %198 = vmatprep.mubr.f32.mxu1 %v935_v0  ;;  %v990_v4 = vld [vmem:[#allocation2 + $0x28] sm:$0xff]  ;;  %v815_v5 = vpack.c.bf16 %v988_v3, %v986_v2  ;;  %v994_v6 = vld [vmem:[#allocation2 + $0x38] sm:$0xff]  ;;  %v996_v7 = vld [vmem:[#allocation2] sm:$0xff]  ;;  %vm59_vm0 = vcmask 130048   ;;  %vm318_vm1 = vcmask 64512   ;;  %s937_s20 = smov [#allocation5]  }
  0x16   :  { %838 = vset.pattern.permute.xlu0 %v936_v1  ;;  %839 = vset.pattern.permute.xlu1 %v936_v1  ;;  %v998_v8 = vld [vmem:[#allocation2 + $0x10] sm:$0xff]  ;;  %v819_v9 = vpack.c.bf16 %v994_v6, %v990_v4  ;;  %v1004_v11 = vld [vmem:[#allocation2 + $0x20] sm:$0xff]  ;;  %s773_s21 = sshll.u32 %s937_s20, 4  ;;  %s774_s21 = int_to_ptr.vmem [resolvable:$true] %s773_s21 }
  0x17   :  { %v817_v10 = vpack.c.bf16 %v998_v8, %v996_v7  ;;  %v1006_v12 = vld [vmem:[#allocation2 + $0x30] sm:$0xff]  ;;  %816 = vmatprep.subr.bf16.mxu0 %v815_v5  ;;  %v38_v14 = vld [vmem:[%s1129_s3] sm:$0xff]  ;;  %s882_s22 = scalar_lea.vmem %s774_s21, 512  ;;  %p887_p9 = scmp.lt.s32.totalorder %s774_s21, %s774_s21 }
  0x18   :  { %v821_v13 = vpack.c.bf16 %v1006_v12, %v1004_v11  ;;  %820 = vmatprep.subr.bf16.mxu1 %v819_v9  ;;  %v35_v15 = vld [vmem:[%s1127_s1] sm:$0xff]  ;;  %56 = vperm.xlu0 %838, %v38_v14   ;;  %p883_p8 = scmp.ne.s32.totalorder %s774_s21, %s882_s22  ;;  %p888_p10 = scmp.lt.s32.totalorder %s882_s22, %s882_s22 }
  0x19   :  { %818 = vmatpush1.bf16.msra.mxu0 %v817_v10 }
  0x1a   :  { %822 = vmatpush1.bf16.msra.mxu1 %v821_v13  ;;  %p889_p11 = por %p888_p10, %p887_p9 }
  0x1c   :  { %805 = vmatmul.mubr.msk.f32.vlgmr.msra.gmra.mrb[0].mxu0 %vm59_vm0, %v35_v15  ;;  %p890_p12 = pnand %p889_p11, %p883_p8 }
  0x1d   :  { %806 = vmatmul.mubr.msk.f32.vlgmr.msra.gmra.mrb[0].mxu1 %vm59_vm0, %v35_v15  ;;  %389 = vmatprep.mubr.f32.mxu0 %v935_v0 }
  0x1e   :  { %466 = vmatprep.mubr.f32.mxu1 %v935_v0 }
  0x36   :  { %286 = vxpose.xlu0.b32.start.end [1/1] (short) (narrow) %v35_v15, 16 }
  0x97   :  { %v57_v16 = vpop.permute.xlu0 %56 }
  0xef   :  { %v129_v17 = vpop.f32.mrb[0].mxu0 }
  0xf0   :  { %v130_v18 = vadd.f32 %v129_v17, %v57_v16  ;;  %v200_v19 = vpop.f32.mrb[0].mxu1  ;;  %v131_v20 = vpop.f32.mrb[1].mxu0 }
  0xf1   :  { %v201_v21 = vadd.f32 %v200_v19, %v57_v16  ;;  %v132_v22 = vadd.f32 %v131_v20, %v57_v16  ;;  %v202_v23 = vpop.f32.mrb[1].mxu1 }
  0xf2   :  { %205 = vst [vmem:[#allocation5] sm:$0xff] %v130_v18  ;;  %v210_v24 = vmul.f32 0.5, %v130_v18  ;;  %v203_v25 = vadd.f32 %v202_v23, %v57_v16 }
  0xf3   :  { %208 = vst [vmem:[#allocation5 + $0x10] sm:$0xff] %v201_v21  ;;  %v212_v26 = vmul.f32 0.5, %v201_v21  ;;  %206 = vst [vmem:[#allocation5 + $0x8] sm:$0xff] %v132_v22  ;;  %v211_v27 = vmul.f32 0.5, %v132_v22 }
  0xf4   :  { %v214_v28 = vrot.slane %v210_v24, 4  ;;  %209 = vst [vmem:[#allocation5 + $0x18] sm:$0xff] %v203_v25  ;;  %v213_v29 = vmul.f32 0.5, %v203_v25 }
  0xf5   :  { %v226_v30 = vrot.slane %v212_v26, 4  ;;  %v220_v31 = vrot.slane %v211_v27, 4 }
  0xf6   :  { %v215_v32 = vmax.f32 %v210_v24, %v214_v28  ;;  %v232_v33 = vrot.slane %v213_v29, 4 }
  0xf7   :  { %v227_v34 = vmax.f32 %v212_v26, %v226_v30  ;;  %v221_v35 = vmax.f32 %v211_v27, %v220_v31 }
  0xf8   :  { %v216_v36 = vrot.slane %v215_v32, 2  ;;  %v233_v37 = vmax.f32 %v213_v29, %v232_v33 }
  0xf9   :  { %v228_v38 = vrot.slane %v227_v34, 2  ;;  %v222_v39 = vrot.slane %v221_v35, 2 }
  0xfa   :  { %v217_v40 = vmax.f32 %v215_v32, %v216_v36  ;;  %v234_v41 = vrot.slane %v233_v37, 2 }
  0xfb   :  { %v229_v42 = vmax.f32 %v227_v34, %v228_v38  ;;  %v223_v43 = vmax.f32 %v221_v35, %v222_v39 }
  0xfc   :  { %v218_v44 = vrot.slane %v217_v40, 1  ;;  %v235_v45 = vmax.f32 %v233_v37, %v234_v41  ;;  %v302_v37 = vpop.trf.xlu0 }
  0xfd   :  { %v230_v46 = vrot.slane %v229_v42, 1  ;;  %v224_v47 = vrot.slane %v223_v43, 1 }
  0xfe   :  { %v219_v48 = vmax.f32 %v217_v40, %v218_v44  ;;  %v236_v49 = vrot.slane %v235_v45, 1 }
  0xff   :  { %v231_v50 = vmax.f32 %v229_v42, %v230_v46  ;;  %v225_v51 = vmax.f32 %v223_v43, %v224_v47 }
 0x100   :  { %v238_v52 = vsub.f32 %v210_v24, %v219_v48  ;;  %v237_v53 = vmax.f32 %v235_v45, %v236_v49  ;;  %v303_v43 = vpop.trf.xlu0 }
 0x101   :  { %v240_v54 = vsub.f32 %v212_v26, %v231_v50  ;;  %v239_v55 = vsub.f32 %v211_v27, %v225_v51 }
 0x102   :  { %v242_v56 = vmul.f32 1.442695, %v238_v52  ;;  %v241_v57 = vsub.f32 %v213_v29, %v237_v53 }
 0x103   :  { %v246_v58 = vmul.f32 1.442695, %v240_v54  ;;  %v244_v59 = vmul.f32 1.442695, %v239_v55 }
 0x104   :  { %840 = vpow2.f32 %v242_v56  ;;  %v248_v60 = vmul.f32 1.442695, %v241_v57 }
 0x105   :  { %842 = vpow2.f32 %v246_v58 }
 0x106   :  { %844 = vpow2.f32 %v244_v59 }
 0x107   :  { %846 = vpow2.f32 %v248_v60 }
 0x10e   :  { %v841_v61 = vpop.eup %840 }
 0x10f   :  { %v843_v62 = vpop.eup %842  ;;  %v250_v63 = vrot.slane %v841_v61, 4 }
 0x110   :  { %v845_v1 = vpop.eup %844  ;;  %v262_v5 = vrot.slane %v843_v62, 4 }
 0x111   :  { %v847_v9 = vpop.eup %846  ;;  %v256_v10 = vrot.slane %v845_v1, 4  ;;  %v251_v13 = vadd.f32 %v841_v61, %v250_v63 }
 0x112   :  { %v268_v14 = vrot.slane %v847_v9, 4  ;;  %v263_v15 = vadd.f32 %v843_v62, %v262_v5  ;;  %v37_v5 = vld [vmem:[%s1128_s2 + $0x8] sm:$0xff] }
 0x113   :  { %v257_v16 = vadd.f32 %v845_v1, %v256_v10  ;;  %v252_v17 = vrot.slane %v251_v13, 2 }
 0x114   :  { %v269_v18 = vadd.f32 %v847_v9, %v268_v14  ;;  %v264_v19 = vrot.slane %v263_v15, 2 }
 0x115   :  { %v258_v20 = vrot.slane %v257_v16, 2  ;;  %v253_v21 = vadd.f32 %v252_v17, %v251_v13 }
 0x116   :  { %v270_v22 = vrot.slane %v269_v18, 2  ;;  %v265_v23 = vadd.f32 %v264_v19, %v263_v15 }
 0x117   :  { %v259_v24 = vadd.f32 %v258_v20, %v257_v16  ;;  %v254_v25 = vrot.slane %v253_v21, 1 }
 0x118   :  { %v271_v26 = vadd.f32 %v270_v22, %v269_v18  ;;  %v266_v27 = vrot.slane %v265_v23, 1 }
 0x119   :  { %v260_v28 = vrot.slane %v259_v24, 1  ;;  %v255_v29 = vadd.f32 %v254_v25, %v253_v21 }
 0x11a   :  { %v272_v30 = vrot.slane %v271_v26, 1  ;;  %v267_v31 = vadd.f32 %v266_v27, %v265_v23 }
 0x11b   :  { %v261_v32 = vadd.f32 %v260_v28, %v259_v24  ;;  %848 = vrcp.f32 %v255_v29 }
 0x11c   :  { %v273_v33 = vadd.f32 %v272_v30, %v271_v26  ;;  %850 = vrcp.f32 %v267_v31 }
 0x11d   :  { %852 = vrcp.f32 %v261_v32 }
 0x11e   :  { %854 = vrcp.f32 %v273_v33 }
 0x125   :  { %v849_v34 = vpop.eup %848 }
 0x126   :  { %v851_v35 = vpop.eup %850  ;;  %v282_v41 = vmul.f32 %v849_v34, %v841_v61 }
 0x127   :  { %v853_v36 = vpop.eup %852  ;;  %v284_v42 = vmul.f32 %v851_v35, %v843_v62 }
 0x128   :  { %v855_v38 = vpop.eup %854  ;;  %v283_v39 = vmul.f32 %v853_v36, %v845_v1  ;;  %v36_v1 = vld [vmem:[%s1128_s2] sm:$0xff] }
 0x129   :  { %v285_v40 = vmul.f32 %v855_v38, %v847_v9 }
 0x12a   :  { %325 = vmatprep.subr.mxu0 %v283_v39 }
 0x12b   :  { %402 = vmatprep.subr.mxu1 %v285_v40  ;;  %326 = vmatpush1.msra.mxu0 %v282_v41 }
 0x12c   :  { %403 = vmatpush1.msra.mxu1 %v284_v42  ;;  %807 = vmatmul.mubr.msk.f32.vlgmr.msra.gmra.mrb[2].mxu0 %vm318_vm1, %v302_v37 }
 0x12d   :  { %809 = vmatmul.mubr.msk.f32.vlgmr.msra.gmra.mrb[2].mxu1 %vm318_vm1, %v302_v37  ;;  %395 = vmatprep.mubr.f32.mxu0 %v935_v0 }
 0x12e   :  { %472 = vmatprep.mubr.f32.mxu1 %v935_v0 }
 0x130   :  { %808 = vmatmul.mubr.msk.f32.gmra.mrb[4].mxu0 %vm318_vm1, %v303_v43 }
 0x131   :  { %810 = vmatmul.mubr.msk.f32.gmra.mrb[4].mxu1 %vm318_vm1, %v303_v43  ;;  %557 = vmatprep.mubr.f32.mxu0 %v935_v0 }
 0x132   :  { %634 = vmatprep.mubr.f32.mxu1 %v935_v0 }
 0x1ff   :  { %v391_v44 = vpop.f32.mrb[2].mxu0 }
 0x200   :  { %v468_v45 = vpop.f32.mrb[2].mxu1  ;;  %v393_v46 = vpop.f32.mrb[3].mxu0  ;;  %v479_v49 = vmax.f32 %v391_v44, 0.0 }
 0x201   :  { %v470_v47 = vpop.f32.mrb[3].mxu1  ;;  %v481_v53 = vmax.f32 %v468_v45, 0.0  ;;  %v480_v54 = vmax.f32 %v393_v46, 0.0 }
 0x202   :  { %v482_v58 = vmax.f32 %v470_v47, 0.0 }
 0x203   :  { %v397_v48 = vpop.f32.mrb[4].mxu0 }
 0x204   :  { %v483_v50 = vmax.f32 %v397_v48, 0.0  ;;  %v474_v51 = vpop.f32.mrb[4].mxu1  ;;  %v399_v52 = vpop.f32.mrb[5].mxu0 }
 0x205   :  { %v485_v55 = vmax.f32 %v474_v51, 0.0  ;;  %v484_v56 = vmax.f32 %v399_v52, 0.0  ;;  %v476_v57 = vpop.f32.mrb[5].mxu1 }
 0x206   :  { %v825_v59 = vpack.c.bf16 %v483_v50, %v479_v49  ;;  %v486_v60 = vmax.f32 %v476_v57, 0.0 }
 0x207   :  { %v829_v61 = vpack.c.bf16 %v485_v55, %v481_v53  ;;  %v823_v62 = vpack.c.bf16 %v484_v56, %v480_v54  ;;  %v801_v56 = vld [vmem:[%s1129_s3 + $0x10] sm:$0xff] }
 0x208   :  { %v827_v63 = vpack.c.bf16 %v486_v60, %v482_v58  ;;  %v802_v60 = vld [vmem:[%s1129_s3 + $0x18] sm:$0xff] }
 0x209   :  { %824 = vmatprep.subr.bf16.mxu0 %v823_v62 }
 0x20a   :  { %828 = vmatprep.subr.bf16.mxu1 %v827_v63  ;;  %826 = vmatpush1.bf16.msra.mxu0 %v825_v59  ;;  %v803_v59 = vld [vmem:[%s1129_s3 + $0x20] sm:$0xff] }
 0x20b   :  { %830 = vmatpush1.bf16.msra.mxu1 %v829_v61 }
 0x20d   :  { %811 = vmatmul.mubr.msk.f32.vlgmr.msra.gmra.mrb[6].mxu0 %vm59_vm0, %v36_v1 }
 0x20e   :  { %563 = vmatprep.mubr.f32.mxu0 %v935_v0  ;;  %813 = vmatmul.mubr.msk.f32.vlgmr.msra.gmra.mrb[6].mxu1 %vm59_vm0, %v36_v1 }
 0x20f   :  { %640 = vmatprep.mubr.f32.mxu1 %v935_v0 }
 0x211   :  { %812 = vmatmul.mubr.msk.f32.gmra.mrb[8].mxu0 %vm59_vm0, %v37_v5 }
 0x212   :  { %814 = vmatmul.mubr.msk.f32.gmra.mrb[8].mxu1 %vm59_vm0, %v37_v5 }
 0x2e0   :  { %v1036_v9 = vpop.f32.mrb[6].mxu0 }
 0x2e1   :  { %v1038_v10 = vpop.f32.mrb[7].mxu0  ;;  %v1040_v13 = vpop.f32.mrb[6].mxu1 }
 0x2e2   :  { %v647_v14 = vadd.f32 %v1038_v10, %v1036_v9  ;;  %v1044_v15 = vpop.f32.mrb[7].mxu1 }
 0x2e4   :  { %v1046_v16 = vpop.f32.mrb[8].mxu0  ;;  %v648_v17 = vadd.f32 %v647_v14, %v1040_v13 }
 0x2e5   :  { %v1049_v0 = vpop.f32.mrb[9].mxu0  ;;  %v1051_v18 = vpop.f32.mrb[8].mxu1 }
 0x2e6   :  { %v652_v19 = vadd.f32 %v1049_v0, %v1046_v16  ;;  %v649_v20 = vadd.f32 %v648_v17, %v1044_v15  ;;  %v1056_v21 = vpop.f32.mrb[9].mxu1 }
 0x2e8   :  { %650 = vadd.xlane.f32.xlu1 %v649_v20  ;;  %v653_v22 = vadd.f32 %v652_v19, %v1051_v18  ;;  %v804_v19 = vld [vmem:[%s1129_s3 + $0x28] sm:$0xff] }
 0x2ea   :  { %v654_v23 = vadd.f32 %v653_v22, %v1056_v21 }
 0x2ec   :  { %655 = vadd.xlane.f32.xlu1 %v654_v23 }
 0x375   :  { %v651_v24 = vpop.xlane.xlu1 %650 }
 0x376   :  { %v657_v25 = vmul.f32 0.001953125, %v651_v24 }
 0x378   :  { %v659_v26 = vsub.f32 %v1036_v9, %v657_v25  ;;  %v660_v27 = vsub.f32 %v1038_v10, %v657_v25  ;;  %v661_v28 = vsub.f32 %v1040_v13, %v657_v25  ;;  %v662_v30 = vsub.f32 %v1044_v15, %v657_v25 }
 0x379   :  { %v656_v29 = vpop.xlane.xlu1 %655  ;;  %v693_v57 = vmul.f32 %v801_v56, %v657_v25 }
 0x37a   :  { %v658_v31 = vmul.f32 0.001953125, %v656_v29  ;;  %v667_v32 = vmul.f32 %v659_v26, %v659_v26  ;;  %v668_v33 = vmul.f32 %v660_v27, %v660_v27  ;;  %v669_v34 = vmul.f32 %v661_v28, %v661_v28 }
 0x37b   :  { %v670_v39 = vmul.f32 %v662_v30, %v662_v30 }
 0x37c   :  { %v675_v35 = vadd.f32 %v668_v33, %v667_v32  ;;  %v663_v36 = vsub.f32 %v1046_v16, %v658_v31  ;;  %v664_v37 = vsub.f32 %v1049_v0, %v658_v31  ;;  %v665_v38 = vsub.f32 %v1051_v18, %v658_v31 }
 0x37d   :  { %v666_v41 = vsub.f32 %v1056_v21, %v658_v31  ;;  %v694_v1 = vmul.f32 %v802_v60, %v658_v31 }
 0x37e   :  { %v676_v40 = vadd.f32 %v675_v35, %v669_v34  ;;  %v671_v42 = vmul.f32 %v663_v36, %v663_v36  ;;  %v672_v43 = vmul.f32 %v664_v37, %v664_v37  ;;  %v673_v45 = vmul.f32 %v665_v38, %v665_v38 }
 0x37f   :  { %v674_v47 = vmul.f32 %v666_v41, %v666_v41 }
 0x380   :  { %v677_v44 = vadd.f32 %v676_v40, %v670_v39  ;;  %v680_v46 = vadd.f32 %v672_v43, %v671_v42 }
 0x382   :  { %678 = vadd.xlane.f32.xlu1 %v677_v44  ;;  %v681_v48 = vadd.f32 %v680_v46, %v673_v45 }
 0x384   :  { %v682_v49 = vadd.f32 %v681_v48, %v674_v47 }
 0x386   :  { %683 = vadd.xlane.f32.xlu1 %v682_v49 }
 0x40f   :  { %v679_v50 = vpop.xlane.xlu1 %678 }
 0x410   :  { %v685_v51 = vmul.f32 0.001953125, %v679_v50 }
 0x412   :  { %v687_v52 = vadd.f32 1e-05, %v685_v51 }
 0x413   :  { %v684_v53 = vpop.xlane.xlu1 %683 }
 0x414   :  { %856 = vrsqrt.f32 %v687_v52  ;;  %v686_v54 = vmul.f32 0.001953125, %v684_v53 }
 0x416   :  { %v688_v55 = vadd.f32 1e-05, %v686_v54 }
 0x418   :  { %858 = vrsqrt.f32 %v688_v55 }
 0x41e   :  { %v857_v58 = vpop.eup %856 }
 0x41f   :  { %v691_v61 = vmul.f32 %v857_v58, %v801_v56  ;;  %v695_v62 = vmul.f32 %v857_v58, %v693_v57 }
 0x421   :  { %701 = vperm.xlu1 %839, %v691_v61   ;;  %v697_v63 = vsub.f32 %v803_v59, %v695_v62 }
 0x422   :  { %v859_v5 = vpop.eup %858 }
 0x423   :  { %719 = vperm.xlu0 %838, %v697_v63   ;;  %v692_v14 = vmul.f32 %v859_v5, %v802_v60  ;;  %v696_v17 = vmul.f32 %v859_v5, %v694_v1 }
 0x425   :  { %706 = vperm.xlu1 %839, %v692_v14   ;;  %v698_v20 = vsub.f32 %v804_v19, %v696_v17 }
 0x429   :  { %724 = vperm.xlu1 %839, %v698_v20  }
 0x42a   :  { %893 = shalt.err (!%p890_p12)
}
 0x42b   :  { %s894_s25 = scalar_lea.hbm %s1130_s4, 512 }
 0x42c   :  { %p895_p13 = scmp.ne.s32.totalorder %s1130_s4, %s894_s25  ;;  %p898_p0 = scmp.lt.u32.totalorder %s894_s25, %s1130_s4 }
 0x42e   :  { %p900_p1 = pnand %p898_p0, %p895_p13 }
 0x430   :  { %903 = shalt.err (!%p900_p1)
}
 0x431   :  { %779 = dma.vmem_to_hbm [thread:$0]  %s774_s21, 512, %s1130_s4, [#allocation4], %s933_s28, %s933_s28, %s934_s29  }
 0x432   :  { %s938_s4 = smov [#allocation6]  }
 0x433   :  { %s785_s7 = sshll.u32 %s938_s4, 4  ;;  %s786_s7 = int_to_ptr.vmem [resolvable:$true] %s785_s7 }
 0x434   :  { %s904_s8 = scalar_lea.vmem %s786_s7, 1024  ;;  %p909_p3 = scmp.lt.s32.totalorder %s786_s7, %s786_s7 }
 0x435   :  { %p905_p2 = scmp.ne.s32.totalorder %s786_s7, %s904_s8  ;;  %p910_p4 = scmp.lt.s32.totalorder %s904_s8, %s904_s8 }
 0x437   :  { %p911_p5 = por %p910_p4, %p909_p3 }
 0x439   :  { %p912_p6 = pnand %p911_p5, %p905_p2 }
 0x4a0   :  { %v702_v22 = vpop.permute.xlu1 %701 }
 0x4a1   :  { %v709_v23 = vmul.f32 %v702_v22, %v1036_v9  ;;  %v710_v24 = vmul.f32 %v702_v22, %v1038_v10  ;;  %v711_v25 = vmul.f32 %v702_v22, %v1040_v13  ;;  %v712_v26 = vmul.f32 %v702_v22, %v1044_v15 }
 0x4a2   :  { %v720_v27 = vpop.permute.xlu0 %719 }
 0x4a3   :  { %v727_v28 = vadd.f32 %v720_v27, %v709_v23  ;;  %v728_v29 = vadd.f32 %v720_v27, %v710_v24  ;;  %v729_v30 = vadd.f32 %v720_v27, %v711_v25  ;;  %v730_v31 = vadd.f32 %v720_v27, %v712_v26 }
 0x4a4   :  { %v707_v32 = vpop.permute.xlu1 %706 }
 0x4a5   :  { %v735_v33 = vadd.f32 %v727_v28, %v996_v7  ;;  %v736_v34 = vadd.f32 %v728_v29, %v986_v2  ;;  %v737_v35 = vadd.f32 %v729_v30, %v1004_v11  ;;  %v738_v9 = vadd.f32 %v730_v31, %v990_v4 }
 0x4a6   :  { %v713_v15 = vmul.f32 %v707_v32, %v1046_v16  ;;  %v714_v38 = vmul.f32 %v707_v32, %v1049_v0  ;;  %v715_v39 = vmul.f32 %v707_v32, %v1051_v18  ;;  %v716_v40 = vmul.f32 %v707_v32, %v1056_v21 }
 0x4a7   :  { %v743_v36 = vmul.f32 0.5, %v735_v33  ;;  %v744_v10 = vmul.f32 0.5, %v736_v34  ;;  %v745_v37 = vmul.f32 0.5, %v737_v35  ;;  %v746_v13 = vmul.f32 0.5, %v738_v9 }
 0x4a8   :  { %v725_v41 = vpop.permute.xlu1 %724 }
 0x4a9   :  { %v751_v7 = vmax.f32 %v743_v36, 0.0  ;;  %v752_v42 = vmax.f32 %v744_v10, 0.0  ;;  %v753_v2 = vmax.f32 %v745_v37, 0.0  ;;  %v754_v43 = vmax.f32 %v746_v13, 0.0 }
 0x4aa   :  { %v731_v11 = vadd.f32 %v725_v41, %v713_v15  ;;  %v732_v44 = vadd.f32 %v725_v41, %v714_v38  ;;  %v733_v4 = vadd.f32 %v725_v41, %v715_v39  ;;  %v734_v45 = vadd.f32 %v725_v41, %v716_v40 }
 0x4ab   :  { %759 = vst [vmem:[#allocation6] sm:$0xff] %v751_v7  ;;  %760 = vst [vmem:[#allocation6 + $0x8] sm:$0xff] %v752_v42 }
 0x4ac   :  { %764 = vst [vmem:[#allocation6 + $0x20] sm:$0xff] %v753_v2  ;;  %765 = vst [vmem:[#allocation6 + $0x28] sm:$0xff] %v754_v43  ;;  %v739_v16 = vadd.f32 %v731_v11, %v998_v8  ;;  %v740_v0 = vadd.f32 %v732_v44, %v988_v3  ;;  %v741_v18 = vadd.f32 %v733_v4, %v1006_v12 }
 0x4ad   :  { %v742_v21 = vadd.f32 %v734_v45, %v994_v6 }
 0x4ae   :  { %v747_v46 = vmul.f32 0.5, %v739_v16  ;;  %v748_v47 = vmul.f32 0.5, %v740_v0  ;;  %v749_v48 = vmul.f32 0.5, %v741_v18 }
 0x4af   :  { %v750_v49 = vmul.f32 0.5, %v742_v21 }
 0x4b0   :  { %v755_v50 = vmax.f32 %v747_v46, 0.0  ;;  %v756_v51 = vmax.f32 %v748_v47, 0.0  ;;  %v757_v52 = vmax.f32 %v749_v48, 0.0 }
 0x4b1   :  { %v758_v53 = vmax.f32 %v750_v49, 0.0 }
 0x4b2   :  { %761 = vst [vmem:[#allocation6 + $0x10] sm:$0xff] %v755_v50  ;;  %762 = vst [vmem:[#allocation6 + $0x18] sm:$0xff] %v756_v51 }
 0x4b3   :  { %766 = vst [vmem:[#allocation6 + $0x30] sm:$0xff] %v757_v52  ;;  %767 = vst [vmem:[#allocation6 + $0x38] sm:$0xff] %v758_v53 }
 0x4b4   :  { %915 = shalt.err (!%p912_p6)
}
 0x4b5   :  { %s916_s10 = scalar_lea.hbm %s1131_s5, 1024 }
 0x4b6   :  { %p917_p7 = scmp.ne.s32.totalorder %s1131_s5, %s916_s10  ;;  %p920_p8 = scmp.lt.u32.totalorder %s916_s10, %s1131_s5 }
 0x4b8   :  { %p922_p9 = pnand %p920_p8, %p917_p7 }
 0x4ba   :  { %925 = shalt.err (!%p922_p9)
}
 0x4bb   :  { %791 = dma.vmem_to_hbm [thread:$0]  %s786_s7, 1024, %s1131_s5, [#allocation7], %s933_s28, %s933_s28, %s934_s29  }
 0x4bc   :  { %928 = dma.done.wait [#allocation4], 512  }
 0x4bd   :  { %929 = vsyncadd [#allocation4], 4294966784 }
 0x4be   :  { %930 = dma.done.wait [#allocation7], 1024  }
 0x4bf   :  { %931 = vsyncadd [#allocation7], 4294966272 }
 0x4c0   :  { %798 = vsyncpa [#allocation3], 1 }
 0x4c1   :  { %799 = vsyncpa [#allocation4], 1 }
 0x4c2   :  { %800 = vsyncpa [#allocation7], 1 }

</bundles_post_ra>
